<compile_context>
chip_gen: v7x
topology: tpu7x:2x2x1
jax: 0.10.0
libtpu: 0.0.40
codegen_flags: <defaults>
</compile_context>

<pallas_src>
import functools

import jax
import jax.numpy as jnp
from jax.experimental import pallas as pl
from jax.experimental.pallas import tpu as pltpu


def _mm_layernorm_kernel(fw_ref, *refs, epsilon, num_modalities, n_elems):
    # refs = (x_0, ..., x_{M-1}, gamma, beta, o_ref, acc_scratch)
    x_refs = refs[:num_modalities]
    gamma_ref = refs[num_modalities]
    beta_ref = refs[num_modalities + 1]
    o_ref = refs[num_modalities + 2]
    acc_ref = refs[num_modalities + 3]

    inv_n = 1.0 / n_elems
    # torch.std defaults to the UNBIASED estimator (divide by N - 1).
    inv_nm1 = 1.0 / max(n_elems - 1, 1)

    for m in range(num_modalities):
        x = x_refs[m][...].astype(jnp.float32)                   # (bt, R, L)

        # Pass 1: mean.  Reduce the row/sublane axis first (pure VALU adds),
        # then a single cross-lane (XLU) reduce per batch element.
        s = jnp.sum(jnp.sum(x, axis=1, keepdims=True), axis=2, keepdims=True)
        mean = s * inv_n                                          # (bt, 1, 1)

        # Pass 2: centered sum of squares (numerically stable, matches
        # torch.std far better than E[x^2] - E[x]^2 for large means).
        c = x - mean
        ss = jnp.sum(jnp.sum(c * c, axis=1, keepdims=True), axis=2, keepdims=True)
        std = jnp.sqrt(ss * inv_nm1)

        # epsilon is added to STD (not variance), exactly like the module.
        # Tiny (bt, 1, 1) divide; the broadcast multiply does the heavy work.
        scale = fw_ref[m] / (std + epsilon)
        contrib = c * scale

        if m == 0:
            acc_ref[...] = contrib
        else:
            acc_ref[...] = acc_ref[...] + contrib

    out = (gamma_ref[...].astype(jnp.float32) * acc_ref[...]
           + beta_ref[...].astype(jnp.float32))
    o_ref[...] = out.astype(o_ref.dtype)


def _vmem_capacity_bytes():
    """Physical VMEM per TensorCore for the current generation (best effort)."""
    try:
        return int(pltpu.get_tpu_info().vmem_capacity_bytes)
    except Exception:
        pass
    try:
        kind = jax.devices()[0].device_kind.lower()
    except Exception:
        kind = ""
    if "v7" in kind or "7x" in kind:
        return 64 * 1024 * 1024        # v7x: 64 MiB per TensorCore
    return 128 * 1024 * 1024           # v4 / v5e / v5p / v6e: 128 MiB


def _cdiv(a, b):
    return -(-a // b)


def mm_layernorm(modalities, fusion_weights, gamma, beta, epsilon=1e-5):
    """modalities: list of (B, S, D) arrays (all same shape and dtype)."""
    M = len(modalities)
    B, S, D = modalities[0].shape
    out_dtype = modalities[0].dtype

    # Layout: keep (S, D) when D is already lane-dense (multiple of 128); only
    # fold to (S*D/128, 128) rows when D is not 128-aligned but S*D is.  In
    # both lane-dense cases output stores are unmasked full-lane vst.
    if D % 128 == 0 or (S * D) % 128 != 0:
        R, L = S, D
        fold = False
    else:
        R, L = (S * D) // 128, 128
        fold = True

    xs = [m.reshape(B, R, L) for m in modalities]
    if fold:
        g_in = jnp.broadcast_to(gamma.reshape(1, D), (S, D)).reshape(1, R, L)
        b_in = jnp.broadcast_to(beta.reshape(1, D), (S, D)).reshape(1, R, L)
        gb_block = (1, R, L)
    else:
        g_in = gamma.reshape(1, 1, D)
        b_in = beta.reshape(1, 1, D)
        gb_block = (1, 1, D)

    # --- per-generation VMEM budget & honest per-batch-element footprint -----
    capacity = _vmem_capacity_bytes()
    budget = max(capacity // 2 - (8 << 20), 16 << 20)   # ~24 MiB v7x, ~56 MiB v5e/v6e
    elem = R * L
    in_isz = jnp.dtype(modalities[0].dtype).itemsize
    out_isz = jnp.dtype(out_dtype).itemsize
    per_batch = elem * (2 * M * in_isz    # double-buffered inputs (real dtype)
                        + 2 * out_isz     # double-buffered output
                        + 4               # explicit f32 accumulator scratch
                        + 3 * 4)          # transient f32 temps (x, centered, contrib)
    fixed = 2 * 2 * g_in.size * jnp.dtype(g_in.dtype).itemsize  # gamma + beta blocks

    bt = max(1, min(B, max(budget - fixed, 0) // per_batch))
    # Keep >= 2 grid steps when B allows it so both v7x TensorCores get work.
    if B >= 2 and _cdiv(B, bt) < 2:
        bt = _cdiv(B, 2)
    num_steps = _cdiv(B, bt)
    # TODO(synk): for S*D so large that even bt=1 exceeds the budget, tile the
    # reduction extent (chunked lax.fori_loop over row slices) instead of only
    # raising vmem_limit_bytes.
    # TODO(synk): when B == 1 a second parallel grid axis over R (two-phase
    # stats-then-normalize) would let both v7x TensorCores share the work.

    est = fixed + bt * per_batch
    vmem_limit = int(min(capacity - (8 << 20),
                         max(est + (8 << 20), budget + (8 << 20))))

    kernel = functools.partial(
        _mm_layernorm_kernel,
        epsilon=float(epsilon),
        num_modalities=M,
        n_elems=S * D,
    )

    out = pl.pallas_call(
        kernel,
        out_shape=jax.ShapeDtypeStruct((B, R, L), out_dtype),
        grid_spec=pltpu.PrefetchScalarGridSpec(
            num_scalar_prefetch=0,
            grid=(num_steps,),
            in_specs=(
                # fusion weights: tiny 1-D array, whole thing in SMEM
                [pl.BlockSpec(memory_space=pltpu.MemorySpace.SMEM)]
                # one (bt, R, L) block per modality per grid step
                + [pl.BlockSpec((bt, R, L), lambda i: (i, 0, 0)) for _ in range(M)]
                # gamma / beta blocks, shared across grid steps
                + [pl.BlockSpec(gb_block, lambda i: (0, 0, 0)),
                   pl.BlockSpec(gb_block, lambda i: (0, 0, 0))]
            ),
            out_specs=pl.BlockSpec((bt, R, L), lambda i: (i, 0, 0)),
            scratch_shapes=[pltpu.VMEM((bt, R, L), jnp.float32)],
        ),
        compiler_params=pltpu.CompilerParams(
            dimension_semantics=("parallel",),
            vmem_limit_bytes=vmem_limit),
    )(fusion_weights.astype(jnp.float32), *xs, g_in, b_in)

    return out.reshape(B, S, D)


def mm_layernorm_ref(modalities, fusion_weights, gamma, beta, epsilon=1e-5):
    """Pure-JAX reference matching the PyTorch forward exactly."""
    out = 0.0
    for i, modality in enumerate(modalities):
        mean = jnp.mean(modality, axis=(1, 2), keepdims=True)
        std = jnp.std(modality, axis=(1, 2), keepdims=True, ddof=1)  # unbiased
        out = out + fusion_weights[i] * (modality - mean) / (std + epsilon)
    return gamma * out + beta


if __name__ == "__main__":
    num_modalities = 2
    B, S, D = 2, 8, 32
    epsilon = 1e-5

    # Deterministic parameter init, exactly as the module's __init__:
    fusion_weights = jnp.ones((num_modalities,), dtype=jnp.float32)
    gamma = jnp.ones((D,), dtype=jnp.float32)
    beta = jnp.zeros((D,), dtype=jnp.float32)

    key = jax.random.PRNGKey(0)
    k1, k2 = jax.random.split(key)
    modality1 = jax.random.normal(k1, (B, S, D), dtype=jnp.float32)
    modality2 = jax.random.normal(k2, (B, S, D), dtype=jnp.float32)
    modalities = [modality1, modality2]

    out = mm_layernorm(modalities, fusion_weights, gamma, beta, epsilon)
    out = jax.block_until_ready(out)

    ref = mm_layernorm_ref(modalities, fusion_weights, gamma, beta, epsilon)
    assert out.shape == (B, S, D)
    assert jnp.allclose(out, ref, atol=1e-5, rtol=1e-5), "mismatch vs reference"

    print("KERNEL_OK")
</pallas_src>

<mosaic_0001>
module attributes {stable_mosaic.version = 11 : i64} {
  func.func @_mm_layernorm_kernel(%arg0: i32, %arg1: memref<2xf32, #tpu.memory_space<smem>>, %arg2: memref<1x2x128xf32, #tpu.memory_space<vmem>>, %arg3: memref<1x2x128xf32, #tpu.memory_space<vmem>>, %arg4: memref<1x2x128xf32, #tpu.memory_space<vmem>>, %arg5: memref<1x2x128xf32, #tpu.memory_space<vmem>>, %arg6: memref<1x2x128xf32, #tpu.memory_space<vmem>>, %arg7: memref<1x2x128xf32, #tpu.memory_space<vmem>>) attributes {dimension_semantics = [#tpu.dimension_semantics<parallel>], iteration_bounds = array<i64: 2>, scalar_prefetch = 0 : i64, scratch_operands = 1 : i64, tpu.core_type = #tpu.core_type<tc>, window_params = [{transform_indices = @transform_0, window_bounds = array<i64: 2>}, {transform_indices = @transform_1, window_bounds = array<i64: 1, 2, 128>}, {transform_indices = @transform_2, window_bounds = array<i64: 1, 2, 128>}, {pipeline_mode = #tpu.pipeline_mode<synchronous>, transform_indices = @transform_3, window_bounds = array<i64: 1, 2, 128>}, {pipeline_mode = #tpu.pipeline_mode<synchronous>, transform_indices = @transform_4, window_bounds = array<i64: 1, 2, 128>}, {transform_indices = @transform_5, window_bounds = array<i64: 1, 2, 128>}]} {
    %c0 = arith.constant 0 : index
    %c0_0 = arith.constant 0 : index
    %c0_1 = arith.constant 0 : index
    %0 = vector.load %arg2[%c0, %c0_0, %c0_1] : memref<1x2x128xf32, #tpu.memory_space<vmem>>, vector<1x2x128xf32>
    %cst = arith.constant dense<0.000000e+00> : vector<1x128xf32>
    %1 = vector.multi_reduction <add>, %0, %cst [1] : vector<1x2x128xf32> to vector<1x128xf32>
    %2 = vector.shape_cast %1 : vector<1x128xf32> to vector<1x1x128xf32>
    %cst_2 = arith.constant dense<0.000000e+00> : vector<1x1xf32>
    %3 = vector.multi_reduction <add>, %2, %cst_2 [2] : vector<1x1x128xf32> to vector<1x1xf32>
    %4 = vector.shape_cast %3 : vector<1x1xf32> to vector<1x1x1xf32>
    %cst_3 = arith.constant 3.906250e-03 : f32
    %5 = vector.broadcast %cst_3 : f32 to vector<1x1x1xf32>
    %6 = arith.mulf %4, %5 : vector<1x1x1xf32>
    %7 = vector.broadcast %6 : vector<1x1x1xf32> to vector<1x2x128xf32>
    %8 = arith.subf %0, %7 : vector<1x2x128xf32>
    %9 = arith.mulf %8, %8 : vector<1x2x128xf32>
    %cst_4 = arith.constant dense<0.000000e+00> : vector<1x128xf32>
    %10 = vector.multi_reduction <add>, %9, %cst_4 [1] : vector<1x2x128xf32> to vector<1x128xf32>
    %11 = vector.shape_cast %10 : vector<1x128xf32> to vector<1x1x128xf32>
    %cst_5 = arith.constant dense<0.000000e+00> : vector<1x1xf32>
    %12 = vector.multi_reduction <add>, %11, %cst_5 [2] : vector<1x1x128xf32> to vector<1x1xf32>
    %13 = vector.shape_cast %12 : vector<1x1xf32> to vector<1x1x1xf32>
    %cst_6 = arith.constant 0.00392156886 : f32
    %14 = vector.broadcast %cst_6 : f32 to vector<1x1x1xf32>
    %15 = arith.mulf %13, %14 : vector<1x1x1xf32>
    %16 = math.sqrt %15 : vector<1x1x1xf32>
    %c0_7 = arith.constant 0 : index
    %17 = memref.load %arg1[%c0_7] : memref<2xf32, #tpu.memory_space<smem>>
    %cst_8 = arith.constant 9.99999974E-6 : f32
    %18 = vector.broadcast %cst_8 : f32 to vector<1x1x1xf32>
    %19 = arith.addf %16, %18 : vector<1x1x1xf32>
    %20 = vector.broadcast %17 : f32 to vector<1x1x1xf32>
    %21 = arith.divf %20, %19 : vector<1x1x1xf32>
    %22 = vector.broadcast %21 : vector<1x1x1xf32> to vector<1x2x128xf32>
    %23 = arith.mulf %8, %22 : vector<1x2x128xf32>
    %c0_9 = arith.constant 0 : index
    %c0_10 = arith.constant 0 : index
    %c0_11 = arith.constant 0 : index
    %24 = vector.load %arg7[%c0_9, %c0_10, %c0_11] : memref<1x2x128xf32, #tpu.memory_space<vmem>>, vector<1x2x128xf32>
    tpu.vector_store %arg7[%c0_9, %c0_10, %c0_11], %23 {strides = array<i32>} : memref<1x2x128xf32, #tpu.memory_space<vmem>>, vector<1x2x128xf32>,
    %c0_12 = arith.constant 0 : index
    %c0_13 = arith.constant 0 : index
    %c0_14 = arith.constant 0 : index
    %25 = vector.load %arg3[%c0_12, %c0_13, %c0_14] : memref<1x2x128xf32, #tpu.memory_space<vmem>>, vector<1x2x128xf32>
    %cst_15 = arith.constant dense<0.000000e+00> : vector<1x128xf32>
    %26 = vector.multi_reduction <add>, %25, %cst_15 [1] : vector<1x2x128xf32> to vector<1x128xf32>
    %27 = vector.shape_cast %26 : vector<1x128xf32> to vector<1x1x128xf32>
    %cst_16 = arith.constant dense<0.000000e+00> : vector<1x1xf32>
    %28 = vector.multi_reduction <add>, %27, %cst_16 [2] : vector<1x1x128xf32> to vector<1x1xf32>
    %29 = vector.shape_cast %28 : vector<1x1xf32> to vector<1x1x1xf32>
    %cst_17 = arith.constant 3.906250e-03 : f32
    %30 = vector.broadcast %cst_17 : f32 to vector<1x1x1xf32>
    %31 = arith.mulf %29, %30 : vector<1x1x1xf32>
    %32 = vector.broadcast %31 : vector<1x1x1xf32> to vector<1x2x128xf32>
    %33 = arith.subf %25, %32 : vector<1x2x128xf32>
    %34 = arith.mulf %33, %33 : vector<1x2x128xf32>
    %cst_18 = arith.constant dense<0.000000e+00> : vector<1x128xf32>
    %35 = vector.multi_reduction <add>, %34, %cst_18 [1] : vector<1x2x128xf32> to vector<1x128xf32>
    %36 = vector.shape_cast %35 : vector<1x128xf32> to vector<1x1x128xf32>
    %cst_19 = arith.constant dense<0.000000e+00> : vector<1x1xf32>
    %37 = vector.multi_reduction <add>, %36, %cst_19 [2] : vector<1x1x128xf32> to vector<1x1xf32>
    %38 = vector.shape_cast %37 : vector<1x1xf32> to vector<1x1x1xf32>
    %cst_20 = arith.constant 0.00392156886 : f32
    %39 = vector.broadcast %cst_20 : f32 to vector<1x1x1xf32>
    %40 = arith.mulf %38, %39 : vector<1x1x1xf32>
    %41 = math.sqrt %40 : vector<1x1x1xf32>
    %c1 = arith.constant 1 : index
    %42 = memref.load %arg1[%c1] : memref<2xf32, #tpu.memory_space<smem>>
    %cst_21 = arith.constant 9.99999974E-6 : f32
    %43 = vector.broadcast %cst_21 : f32 to vector<1x1x1xf32>
    %44 = arith.addf %41, %43 : vector<1x1x1xf32>
    %45 = vector.broadcast %42 : f32 to vector<1x1x1xf32>
    %46 = arith.divf %45, %44 : vector<1x1x1xf32>
    %47 = vector.broadcast %46 : vector<1x1x1xf32> to vector<1x2x128xf32>
    %48 = arith.mulf %33, %47 : vector<1x2x128xf32>
    %c0_22 = arith.constant 0 : index
    %c0_23 = arith.constant 0 : index
    %c0_24 = arith.constant 0 : index
    %49 = vector.load %arg7[%c0_22, %c0_23, %c0_24] : memref<1x2x128xf32, #tpu.memory_space<vmem>>, vector<1x2x128xf32>
    %50 = arith.addf %49, %48 : vector<1x2x128xf32>
    %c0_25 = arith.constant 0 : index
    %c0_26 = arith.constant 0 : index
    %c0_27 = arith.constant 0 : index
    %51 = vector.load %arg7[%c0_25, %c0_26, %c0_27] : memref<1x2x128xf32, #tpu.memory_space<vmem>>, vector<1x2x128xf32>
    tpu.vector_store %arg7[%c0_25, %c0_26, %c0_27], %50 {strides = array<i32>} : memref<1x2x128xf32, #tpu.memory_space<vmem>>, vector<1x2x128xf32>,
    %c0_28 = arith.constant 0 : index
    %c0_29 = arith.constant 0 : index
    %c0_30 = arith.constant 0 : index
    %52 = vector.load %arg4[%c0_28, %c0_29, %c0_30] : memref<1x2x128xf32, #tpu.memory_space<vmem>>, vector<1x2x128xf32>
    %c0_31 = arith.constant 0 : index
    %c0_32 = arith.constant 0 : index
    %c0_33 = arith.constant 0 : index
    %53 = vector.load %arg7[%c0_31, %c0_32, %c0_33] : memref<1x2x128xf32, #tpu.memory_space<vmem>>, vector<1x2x128xf32>
    %54 = arith.mulf %52, %53 : vector<1x2x128xf32>
    %c0_34 = arith.constant 0 : index
    %c0_35 = arith.constant 0 : index
    %c0_36 = arith.constant 0 : index
    %55 = vector.load %arg5[%c0_34, %c0_35, %c0_36] : memref<1x2x128xf32, #tpu.memory_space<vmem>>, vector<1x2x128xf32>
    %56 = arith.addf %54, %55 : vector<1x2x128xf32>
    %c0_37 = arith.constant 0 : index
    %c0_38 = arith.constant 0 : index
    %c0_39 = arith.constant 0 : index
    %57 = vector.load %arg6[%c0_37, %c0_38, %c0_39] : memref<1x2x128xf32, #tpu.memory_space<vmem>>, vector<1x2x128xf32>
    tpu.vector_store %arg6[%c0_37, %c0_38, %c0_39], %56 {strides = array<i32>} : memref<1x2x128xf32, #tpu.memory_space<vmem>>, vector<1x2x128xf32>,
    return
  }
  func.func @transform_0(%arg0: i32) -> i32 {
    %c0_i32 = arith.constant 0 : i32
    %c0_i32_0 = arith.constant 0 : i32
    return %c0_i32 : i32
  }
  func.func @transform_1(%arg0: i32) -> (i32, i32, i32) {
    %c0_i32 = arith.constant 0 : i32
    %c0_i32_0 = arith.constant 0 : i32
    %c0_i32_1 = arith.constant 0 : i32
    return %arg0, %c0_i32, %c0_i32_0 : i32, i32, i32
  }
  func.func @transform_2(%arg0: i32) -> (i32, i32, i32) {
    %c0_i32 = arith.constant 0 : i32
    %c0_i32_0 = arith.constant 0 : i32
    %c0_i32_1 = arith.constant 0 : i32
    return %arg0, %c0_i32, %c0_i32_0 : i32, i32, i32
  }
  func.func @transform_3(%arg0: i32) -> (i32, i32, i32) {
    %c0_i32 = arith.constant 0 : i32
    %c0_i32_0 = arith.constant 0 : i32
    %c0_i32_1 = arith.constant 0 : i32
    %c0_i32_2 = arith.constant 0 : i32
    return %c0_i32, %c0_i32_0, %c0_i32_1 : i32, i32, i32
  }
  func.func @transform_4(%arg0: i32) -> (i32, i32, i32) {
    %c0_i32 = arith.constant 0 : i32
    %c0_i32_0 = arith.constant 0 : i32
    %c0_i32_1 = arith.constant 0 : i32
    %c0_i32_2 = arith.constant 0 : i32
    return %c0_i32, %c0_i32_0, %c0_i32_1 : i32, i32, i32
  }
  func.func @transform_5(%arg0: i32) -> (i32, i32, i32) {
    %c0_i32 = arith.constant 0 : i32
    %c0_i32_0 = arith.constant 0 : i32
    %c0_i32_1 = arith.constant 0 : i32
    return %arg0, %c0_i32, %c0_i32_0 : i32, i32, i32
  }
}

</mosaic_0001>

<bundles_post_ra>
// kernel: tpu_custom_call.1
= control target key start
LH: loop header
LB: loop body
LE: loop exit
PB: predicated region body
PF: predicated region fallthrough
CT: control target
= control target key end

     0   :  { %s1185_s0 = inlined_call_operand.hbm [shape: f32[2], index: 0, kind: input, shape index: {}]   ;;  %s1186_s1 = inlined_call_operand.hbm [shape: f32[2,2,128], index: 1, kind: input, shape index: {}]   ;;  %s1187_s2 = inlined_call_operand.hbm [shape: f32[2,2,128], index: 2, kind: input, shape index: {}]   ;;  %s1188_s3 = inlined_call_operand.hbm [shape: f32[1,2,128], index: 3, kind: input, shape index: {}]   ;;  %s1189_s4 = inlined_call_operand.hbm [shape: f32[1,2,128], index: 4, kind: input, shape index: {}]   ;;  %s1190_s5 = inlined_call_operand.hbm [shape: f32[2,2,128], index: 5, kind: output, shape index: {}]  }
   0x1   :  { %1195 = sst [smem:[#allocation20_spill]] %s1185_s0 }
   0x2   :  { %1196 = sst [smem:[#allocation21_spill]] %s1188_s3 }
   0x3   :  { %10 = vsyncpa [#allocation6], 0 }
   0x4   :  { %11 = vsyncpa [#allocation4], 0 }
   0x5   :  { %13 = vsyncpa [#allocation4 + $0x1], 0 }
   0x6   :  { %14 = vsyncpa [#allocation9], 0 }
   0x7   :  { %16 = vsyncpa [#allocation9 + $0x1], 0 }
   0x8   :  { %17 = vsyncpa [#allocation12], 0 }
   0x9   :  { %18 = vsyncpa [#allocation5], 0 }
   0xa   :  { %20 = vsyncpa [#allocation5 + $0x1], 0  ;;  %s896_s18 = smov 0   ;;  %s898_s19 = smov 0  }
   0xb   :  { %s900_s20 = smov 0   ;;  %s902_s21 = smov 0  }
   0xc LB: > { %s917_s22 = sadd.s32 4294967295, %s858_s21   ;;  %s535_s23 = sadd.s32 4294967294, %s858_s21   ;;  %s858_s21 = sphi %s902_s21, %s1221_s21   ;;  %s854_s20 = sphi %s900_s20, %s1220_s20   ;;  %s850_s19 = sphi %s898_s19, %s1219_s19   ;;  %s846_s18 = sphi %s896_s18, %s1218_s18  }
   0xd   : > { %p67_p0 = scmp.ne.s32.totalorder %s850_s19, %s846_s18  ;;  %p1191_p1 = scmp.eq.s32.totalorder %s917_s22, 0 }
   0xe   : > { %p165_p3 = scmp.eq.s32.totalorder %s535_s23, 1  ;;  %p536_p5 = scmp.ge.s32.totalorder %s858_s21, 1 }
   0xf   : > { %p926_p4 = por %p1191_p1, %p67_p0  ;;  %p172_p7 = scmp.lt.s32.totalorder %s858_s21, 3 }
  0x10   : > { %p931_p6 = por %p165_p3, %p67_p0  ;;  %s860_s27 = smov [#allocation10]  }
  0x11   : > { %s1197_s24 = scalar_select %p926_p4, 1, 0 }
  0x12   : > { %s1198_s25 = scalar_select %p931_p6, 1, 0 }
  0x13   : > { %p936_p8 = pnand %p536_p5, %p172_p7  ;;  %s194_s28 = sshll.u32 %s860_s27, 4  ;;  %s195_s28 = int_to_ptr.vmem [resolvable:$true] %s194_s28 }
  0x14   : > { %s861_s30 = smov [#allocation11]   ;;  %s952_s7 = sadd.s32 1, %s858_s21  }
  0x15   : > { %s1199_s26 = scalar_select %p936_p8, 1, 0 }
  0x16   : > { %p575_p10 = pneg %p936_p8  ;;  %s205_s6 = sshll.u32 %s861_s30, 4  ;;  %s949_s6 = int_to_ptr.vmem [resolvable:$true] %s205_s6 }
  0x17   : > { %s1201_s3 = sld [smem:[#allocation21_spill]] }
  0x18   : > { %p945_p11 = pnand %p575_p10, %p1191_p1 }
  0x1a   : > { %p962_p13 = pneg %p945_p11 }
  0x1d   : > { %s647_s10 = scalar_lea.hbm %s1201_s3, 32 }
  0x1e   : > { %p648_p12 = scmp.ne.s32.totalorder %s1201_s3, %s647_s10  ;;  %p654_p5 = scmp.lt.u32.totalorder %s647_s10, %s1201_s3 }
  0x20   : > { %p650_p0 = pnand %p962_p13, %p648_p12 }
  0x22   : > { %p651_p3 = pneg %p650_p0 }
  0x24   : > { %p656_p7 = pnand %p654_p5, %p651_p3 }
  0x26   : > { %659 = shalt.err (!%p656_p7)
}
  0x27   : > { %s660_s16 = scalar_lea.vmem %s195_s28, 32  ;;  %p668_p2 = scmp.lt.s32.totalorder %s195_s28, %s195_s28 }
  0x28   : > { %p661_p10 = scmp.ne.s32.totalorder %s195_s28, %s660_s16  ;;  %p669_p6 = scmp.lt.s32.totalorder %s660_s16, %s660_s16 }
  0x2a   : > { %p663_p9 = pnand %p661_p10, %p962_p13  ;;  %p670_p4 = por %p669_p6, %p668_p2 }
  0x2c   : > { %p664_p1 = pneg %p663_p9 }
  0x2e   : > { %p671_p8 = pnand %p670_p4, %p664_p1 }
  0x30   : > { %674 = shalt.err (!%p671_p8)
}
  0x31   : > { %581 = dma.hbm_to_vmem [thread:$0]  (!%p945_p11), %s1201_s3, 32, %s195_s28, [#allocation9]  }
  0x32   : > { %s1203_s0 = sld [smem:[#allocation20_spill]] }
  0x38   : > { %s675_s8 = scalar_lea.hbm %s1203_s0, 16 }
  0x39   : > { %p676_p9 = scmp.ne.s32.totalorder %s1203_s0, %s675_s8  ;;  %p682_p1 = scmp.lt.u32.totalorder %s675_s8, %s1203_s0 }
  0x3b   : > { %p678_p12 = pnand %p676_p9, %p962_p13 }
  0x3d   : > { %p679_p2 = pneg %p678_p12 }
  0x3f   : > { %p684_p4 = pnand %p682_p1, %p679_p2 }
  0x41   : > { %687 = shalt.err (!%p684_p4)
}
  0x42   : > { %s862_s14 = smov [#allocation3]   ;;  %s688_s23 = scalar_lea.hbm %s1189_s4, 32 }
  0x43   : > { %578 = dma.hbm_to_smem (!%p945_p11), %s1203_s0, 16, %s862_s14, [#allocation6]  }
  0x44   : > { %p689_p6 = scmp.ne.s32.totalorder %s1189_s4, %s688_s23  ;;  %p695_p3 = scmp.lt.u32.totalorder %s688_s23, %s1189_s4 }
  0x46   : > { %p691_p8 = pnand %p689_p6, %p962_p13 }
  0x48   : > { %p692_p0 = pneg %p691_p8 }
  0x4a   : > { %p697_p5 = pnand %p695_p3, %p692_p0 }
  0x4c   : > { %700 = shalt.err (!%p697_p5)
}
  0x4d   : > { %s701_s10 = scalar_lea.vmem %s949_s6, 32  ;;  %p709_p12 = scmp.lt.s32.totalorder %s949_s6, %s949_s6 }
  0x4e   : > { %p702_p7 = scmp.ne.s32.totalorder %s949_s6, %s701_s10  ;;  %p710_p2 = scmp.lt.s32.totalorder %s701_s10, %s701_s10 }
  0x50   : > { %p704_p10 = pnand %p702_p7, %p962_p13  ;;  %p711_p1 = por %p710_p2, %p709_p12 }
  0x52   : > { %p705_p9 = pneg %p704_p10 }
  0x54   : > { %p712_p4 = pnand %p711_p1, %p705_p9 }
  0x56   : > { %715 = shalt.err (!%p712_p4)
}
  0x57   : > { %584 = dma.hbm_to_vmem [thread:$0]  (!%p945_p11), %s1189_s4, 32, %s949_s6, [#allocation12]  }
  0x58   : > { %s51_s13 = ssub.s32 %s858_s21, %s952_s7  ;;  %s54_s14 = sadd.s32 1, %s854_s20 }
  0x59   : > { %p52_p13 = scmp.eq.s32.totalorder %s51_s13, 0  ;;  %p61_p6 = scmp.ne.s32.totalorder %s854_s20, %s850_s19 }
  0x5a   : > { %p62_p8 = scmp.eq.s32.totalorder %s858_s21, 0  ;;  %p599_p0 = scmp.lt.s32.totalorder %s858_s21, 2 }
  0x5b   : > { %s1025_s29 = scalar_select %p52_p13, %s854_s20, %s54_s14  }
  0x5c   : > { %p63_p3 = por %p62_p8, %p61_p6  ;;  %p1204_p5 = scmp.eq.s32.totalorder %s917_s22, 1 }
  0x5d   : > { %s216_s15 = sand.u32 1, %s854_s20   ;;  %s542_s16 = sshll.u32 %s858_s21, 5 }
  0x5e   : > { %p1029_p7 = por %p1204_p5, %p61_p6  ;;  %s1035_s17 = sshll.u32 %s216_s15, 1 }
  0x5f   : > { %s1040_s27 = scalar_lea.hbm %s1186_s1, %s542_s16  ;;  %s220_s30 = scalar_lea.vmem [#allocation7], %s1035_s17 }
  0x60   : > { %s1205_s28 = scalar_select %p1029_p7, 1, 0 }
  0x61   : > { %s227_s8 = sshll.u32 %s220_s30, 4  ;;  %p1043_p11 = pnand %p599_p0, %p63_p3  ;;  %s1047_s8 = int_to_ptr.vmem [resolvable:$true] %s227_s8 }
  0x62   : > { %s1052_s12 = scalar_lea.hbm %s1187_s2, %s542_s16  ;;  %s217_s13 = scalar_lea.sflag [#allocation4], %s216_s15 }
  0x63   : > { %s716_s14 = scalar_lea.hbm %s1040_s27, 32  ;;  %p718_p9 = pneg %p1043_p11 }
  0x64   : > { %p717_p10 = scmp.ne.s32.totalorder %s1040_s27, %s716_s14  ;;  %s721_s30 = scalar_lea.hbm %s1186_s1, 64 }
  0x65   : > { %p722_p1 = scmp.lt.u32.totalorder %s1040_s27, %s1186_s1  ;;  %p723_p4 = scmp.lt.u32.totalorder %s721_s30, %s716_s14 }
  0x66   : > { %p719_p12 = pnand %p718_p9, %p717_p10  ;;  %p725_p6 = scmp.lt.u32.totalorder %s716_s14, %s1040_s27 }
  0x67   : > { %p724_p13 = por %p723_p4, %p722_p1 }
  0x68   : > { %p720_p2 = pneg %p719_p12 }
  0x69   : > { %p726_p8 = por %p725_p6, %p724_p13 }
  0x6b   : > { %p727_p0 = pnand %p726_p8, %p720_p2 }
  0x6d   : > { %730 = shalt.err (!%p727_p0)
}
  0x6e   : > { %s731_s15 = scalar_lea.vmem %s1047_s8, 32  ;;  %s863_s16 = smov [#allocation7]  }
  0x6f   : > { %p732_p3 = scmp.ne.s32.totalorder %s1047_s8, %s731_s15  ;;  %s736_s10 = sshll.u32 %s863_s16, 4  ;;  %s737_s10 = int_to_ptr.vmem [resolvable:$false] %s736_s10 }
  0x70   : > { %s738_s0 = scalar_lea.vmem %s737_s10, 64  ;;  %p739_p12 = scmp.lt.s32.totalorder %s1047_s8, %s737_s10 }
  0x71   : > { %p734_p5 = pnand %p732_p3, %p718_p9  ;;  %p740_p1 = scmp.lt.s32.totalorder %s738_s0, %s731_s15 }
  0x73   : > { %p735_p10 = pneg %p734_p5  ;;  %p741_p4 = por %p740_p1, %p739_p12 }
  0x75   : > { %p742_p13 = pnand %p741_p4, %p735_p10 }
  0x77   : > { %745 = shalt.err (!%p742_p13)
}
  0x78   : > { %588 = dma.hbm_to_vmem [thread:$0]  (!%p1043_p11), %s1040_s27, 32, %s1047_s8, %s217_s13  }
  0x79   : > { %s234_s3 = sand.u32 1, %s858_s21   ;;  %s238_s11 = scalar_lea.vmem [#allocation8], %s1035_s17 }
  0x7a   : > { %s245_s14 = sshll.u32 %s238_s11, 4  ;;  %s235_s23 = scalar_lea.sflag [#allocation9], %s234_s3  ;;  %s246_s14 = int_to_ptr.vmem [resolvable:$true] %s245_s14 }
  0x7b   : > { %s746_s6 = scalar_lea.hbm %s1052_s12, 32  ;;  %s751_s16 = scalar_lea.hbm %s1187_s2, 64 }
  0x7c   : > { %p747_p2 = scmp.ne.s32.totalorder %s1052_s12, %s746_s6  ;;  %p752_p0 = scmp.lt.u32.totalorder %s1052_s12, %s1187_s2 }
  0x7d   : > { %p753_p3 = scmp.lt.u32.totalorder %s751_s16, %s746_s6  ;;  %p755_p10 = scmp.lt.u32.totalorder %s746_s6, %s1052_s12 }
  0x7e   : > { %p749_p6 = pnand %p747_p2, %p718_p9 }
  0x7f   : > { %p754_p5 = por %p753_p3, %p752_p0 }
  0x80   : > { %p750_p8 = pneg %p749_p6 }
  0x81   : > { %p756_p12 = por %p755_p10, %p754_p5 }
  0x83   : > { %p757_p1 = pnand %p756_p12, %p750_p8 }
  0x85   : > { %760 = shalt.err (!%p757_p1)
}
  0x86   : > { %s761_s17 = scalar_lea.vmem %s246_s14, 32  ;;  %s864_s27 = smov [#allocation8]  }
  0x87   : > { %p762_p4 = scmp.ne.s32.totalorder %s246_s14, %s761_s17  ;;  %s766_s8 = sshll.u32 %s864_s27, 4  ;;  %s767_s8 = int_to_ptr.vmem [resolvable:$false] %s766_s8 }
  0x88   : > { %s768_s13 = scalar_lea.vmem %s767_s8, 64  ;;  %p769_p6 = scmp.lt.s32.totalorder %s246_s14, %s767_s8 }
  0x89   : > { %p764_p13 = pnand %p762_p4, %p718_p9  ;;  %p770_p7 = scmp.lt.s32.totalorder %s768_s13, %s761_s17 }
  0x8b   : > { %p765_p2 = pneg %p764_p13  ;;  %p771_p0 = por %p770_p7, %p769_p6 }
  0x8d   : > { %p772_p3 = pnand %p771_p0, %p765_p2 }
  0x8f   : > { %775 = shalt.err (!%p772_p3)
}
  0x90   : > { %591 = dma.hbm_to_vmem [thread:$0]  (!%p1043_p11), %s1052_s12, 32, %s246_s14, %s235_s23  }
  0x91   : > { %p1207_p8 = scmp.ne.s32.totalorder %s1199_s26, 0 }
  0x92   : > { %p1208_p5 = scmp.eq.s32.totalorder (!%p1207_p8), %s917_s22, 0 }
  0x93   : > { %254 = sbr.rel (%p1207_p8) target bundleno = 557 (0x22d), region = 40 }
  0x9a   : > { %821 = dma.done.wait (%p1208_p5), [#allocation6], 16   ;;  %p1209_p9 = pmov %p1208_p5 }
  0x9b   : > { %s1107_s3 = sand.u32 1, %s850_s19   ;;  %p1210_p7 = scmp.ne.s32.totalorder %s1197_s24, 0 }
  0x9c   : > { %823 = vsyncadd (%p1209_p9), [#allocation6], 4294967280  ;;  %s1110_s11 = sshll.u32 %s1107_s3, 1  ;;  %s261_s9 = scalar_lea.sflag [#allocation4], %s1107_s3 }
  0x9d   : > { %s264_s12 = scalar_lea.vmem [#allocation7], %s1110_s11 }
  0x9e   : > { %825 = dma.done.wait (%p1210_p7), %s261_s9, 32  }
  0x9f   : > { %827 = vsyncadd (%p1210_p7), %s261_s9, 4294967264  ;;  %s269_s26 = sand.u32 1, %s917_s22   ;;  %s273_s23 = scalar_lea.vmem [#allocation8], %s1110_s11 }
  0xa0   : > { %s270_s14 = scalar_lea.sflag [#allocation9], %s269_s26 }
  0xa1   : > { %829 = dma.done.wait (%p1210_p7), %s270_s14, 32  }
  0xa2   : > { %831 = vsyncadd (%p1210_p7), %s270_s14, 4294967264  ;;  %p1211_p11 = pmov %p1208_p5 }
  0xa3   : > { %p1212_p10 = pmov %p1208_p5 }
  0xa4   : > { %833 = dma.done.wait (%p1211_p11), [#allocation9], 32  }
  0xa5   : > { %835 = vsyncadd (%p1212_p10), [#allocation9], 4294967264  ;;  %p1213_p12 = pmov %p1208_p5 }
  0xa6   : > { %p1214_p1 = pmov %p1208_p5 }
  0xa7   : > { %837 = dma.done.wait (%p1213_p12), [#allocation12], 32  }
  0xa8   : > { %839 = vsyncadd (%p1214_p1), [#allocation12], 4294967264 }
  0xa9   : > { %286 = sfence }
  0xaa   : > { %v314_v0 = vld [vmem:[%s264_s12] sm:$0x3]  ;;  %vm315_vm0 = vcmask 1041408   ;;  %v352_v1 = vld [vmem:[%s273_s23] sm:$0x3]  ;;  %s345_s24 = sld [smem:[#allocation3]] }
  0xab   : > { %v316_v2 = vsel %vm315_vm0, %v314_v0, 0.0  ;;  %v353_v3 = vsel %vm315_vm0, %v352_v1, 0.0  ;;  %s552_s6 = sld [smem:[#allocation3 + $0x1]]  ;;  %s554_s30 = sshll.u32 %s917_s22, 5 }
  0xac   : > { %v317_v4 = vrot.slane %v316_v2, 4  ;;  %v354_v5 = vrot.slane %v353_v3, 4  ;;  %s313_s15 = scalar_lea.vmem [#allocation13], %s1110_s11  ;;  %s1141_s17 = scalar_lea.hbm %s1190_s5, %s554_s30 }
  0xad   : > { %s411_s16 = sshll.u32 %s313_s15, 4  ;;  %s398_s27 = scalar_lea.sflag [#allocation5], %s1107_s3  ;;  %s1143_s16 = int_to_ptr.vmem [resolvable:$true] %s411_s16 }
  0xae   : > { %v318_v6 = vadd.f32 %v317_v4, %v316_v2  ;;  %v355_v7 = vadd.f32 %v354_v5, %v353_v3  ;;  %v394_v2 = vld [vmem:[#allocation11] sm:$0x3]  ;;  %s776_s8 = scalar_lea.vmem %s1143_s16, 32  ;;  %p1215_p13 = scmp.ne.s32.totalorder %s1205_s28, 0 }
  0xaf   : > { %p777_p4 = scmp.ne.s32.totalorder %s1143_s16, %s776_s8  ;;  %s865_s22 = smov [#allocation13]  }
  0xb0   : > { %v319_v8 = vrot.slane %v318_v6, 2  ;;  %v356_v9 = vrot.slane %v355_v7, 2  ;;  %v347_v54 = vstv %s345_s24  ;;  %s780_s13 = sshll.u32 %s865_s22, 4  ;;  %s781_s13 = int_to_ptr.vmem [resolvable:$false] %s780_s13 }
  0xb1   : > { %v384_v59 = vstv %s552_s6  ;;  %p778_p2 = pnand %p777_p4, %p1215_p13  ;;  %s782_s11 = scalar_lea.vmem %s781_s13, 64 }
  0xb2   : > { %v320_v10 = vadd.f32 %v319_v8, %v318_v6  ;;  %v357_v11 = vadd.f32 %v356_v9, %v355_v7  ;;  %p783_p0 = scmp.lt.s32.totalorder %s1143_s16, %s781_s13  ;;  %p784_p3 = scmp.lt.s32.totalorder %s782_s11, %s776_s8 }
  0xb3   : > { %p779_p6 = pneg %p778_p2 }
  0xb4   : > { %v321_v12 = vrot.slane %v320_v10, 1  ;;  %v358_v13 = vrot.slane %v357_v11, 1  ;;  %p785_p8 = por %p784_p3, %p783_p0 }
  0xb6   : > { %v322_v14 = vadd.f32 %v321_v12, %v320_v10  ;;  %v359_v15 = vadd.f32 %v358_v13, %v357_v11  ;;  %p786_p5 = pnand %p785_p8, %p779_p6 }
  0xb8   : > { %323 = vadd.xlane.f32.xlu0 %v322_v14 }
  0xbc   : > { %360 = vadd.xlane.f32.xlu0 %v359_v15 }
 0x145   : > { %v324_v16 = vpop.xlane.xlu0 %323 }
 0x146   : > { %v325_v17 = vmul.f32 0.00390625, %v324_v16 }
 0x148   : > { %v326_v18 = vsub.f32 %v314_v0, %v325_v17  ;;  %v391_v0 = vld [vmem:[#allocation10] sm:$0x3] }
 0x149   : > { %v361_v19 = vpop.xlane.xlu0 %360 }
 0x14a   : > { %v327_v20 = vmul.f32 %v326_v18, %v326_v18  ;;  %v362_v21 = vmul.f32 0.00390625, %v361_v19 }
 0x14c   : > { %v363_v22 = vsub.f32 %v352_v1, %v362_v21  ;;  %v328_v23 = vsel %vm315_vm0, %v327_v20, 0.0 }
 0x14d   : > { %v329_v24 = vrot.slane %v328_v23, 4 }
 0x14e   : > { %v364_v25 = vmul.f32 %v363_v22, %v363_v22 }
 0x14f   : > { %v330_v26 = vadd.f32 %v329_v24, %v328_v23 }
 0x150   : > { %v365_v27 = vsel %vm315_vm0, %v364_v25, 0.0 }
 0x151   : > { %v366_v28 = vrot.slane %v365_v27, 4  ;;  %v331_v29 = vrot.slane %v330_v26, 2 }
 0x153   : > { %v332_v30 = vadd.f32 %v331_v29, %v330_v26  ;;  %v367_v31 = vadd.f32 %v366_v28, %v365_v27 }
 0x155   : > { %v333_v32 = vrot.slane %v332_v30, 1  ;;  %v368_v33 = vrot.slane %v367_v31, 2 }
 0x157   : > { %v334_v34 = vadd.f32 %v333_v32, %v332_v30  ;;  %v369_v35 = vadd.f32 %v368_v33, %v367_v31 }
 0x159   : > { %335 = vadd.xlane.f32.xlu1 %v334_v34  ;;  %v370_v36 = vrot.slane %v369_v35, 1 }
 0x15b   : > { %v371_v37 = vadd.f32 %v370_v36, %v369_v35 }
 0x15d   : > { %372 = vadd.xlane.f32.xlu1 %v371_v37 }
 0x1e6   : > { %v336_v38 = vpop.xlane.xlu1 %335 }
 0x1e7   : > { %v337_v39 = vmul.f32 0.003921569, %v336_v38 }
 0x1e9   : > { %639 = vrsqrt.f32 %v337_v39  ;;  %vm340_vm1 = vcmp.eq.f32.partialorder %v337_v39, inf  ;;  %v343_v44 = vand.u32 2147483648, %v337_v39  ;;  %vm342_vm2 = vcmp.eq.f32.partialorder %v337_v39, 0.0 }
 0x1ea   : > { %v373_v40 = vpop.xlane.xlu1 %372 }
 0x1eb   : > { %v374_v41 = vmul.f32 0.003921569, %v373_v40 }
 0x1ed   : > { %641 = vrsqrt.f32 %v374_v41  ;;  %vm377_vm3 = vcmp.eq.f32.partialorder %v374_v41, inf  ;;  %v380_v50 = vand.u32 2147483648, %v374_v41  ;;  %vm379_vm4 = vcmp.eq.f32.partialorder %v374_v41, 0.0 }
 0x1f3   : > { %v640_v42 = vpop.eup %639 }
 0x1f4   : > { %v339_v43 = vmul.f32 %v640_v42, %v337_v39 }
 0x1f6   : > { %v341_v45 = vsel %vm340_vm1, %v337_v39, %v339_v43 }
 0x1f7   : > { %v642_v46 = vpop.eup %641  ;;  %v344_v47 = vsel %vm342_vm2, %v343_v44, %v341_v45 }
 0x1f8   : > { %v346_v48 = vadd.f32 1e-05, %v344_v47  ;;  %v376_v49 = vmul.f32 %v642_v46, %v374_v41 }
 0x1fa   : > { %643 = vrcp.f32 %v346_v48  ;;  %v378_v51 = vsel %vm377_vm3, %v374_v41, %v376_v49 }
 0x1fb   : > { %v381_v52 = vsel %vm379_vm4, %v380_v50, %v378_v51 }
 0x1fc   : > { %v383_v53 = vadd.f32 1e-05, %v381_v52 }
 0x1fe   : > { %645 = vrcp.f32 %v383_v53 }
 0x204   : > { %v644_v55 = vpop.eup %643 }
 0x205   : > { %v349_v56 = vmul.f32 %v644_v55, %v347_v54 }
 0x207   : > { %v350_v57 = vmul.f32 %v349_v56, %v326_v18 }
 0x208   : > { %v646_v58 = vpop.eup %645 }
 0x209   : > { %351 = vst [vmem:[#allocation2] sm:$0x3] %v350_v57  ;;  %v386_v60 = vmul.f32 %v646_v58, %v384_v59 }
 0x20b   : > { %v387_v61 = vmul.f32 %v386_v60, %v363_v22 }
 0x210   : > { %v388_v62 = vld [vmem:[#allocation2] sm:$0x3] }
 0x211   : > { %v389_v63 = vadd.f32 %v388_v62, %v387_v61 }
 0x213   : > { %390 = vst [vmem:[#allocation2] sm:$0x3] %v389_v63 }
 0x21a   : > { %v392_v1 = vld [vmem:[#allocation2] sm:$0x3] }
 0x21b   : > { %v393_v3 = vmul.f32 %v392_v1, %v391_v0 }
 0x21d   : > { %v395_v4 = vadd.f32 %v394_v2, %v393_v3 }
 0x21f   : > { %396 = vst [vmem:[%s313_s15] sm:$0x3] %v395_v4 }
 0x220   : > { %789 = shalt.err (!%p786_p5)
}
 0x221   : > { %s790_s3 = scalar_lea.hbm %s1141_s17, 32  ;;  %s794_s26 = scalar_lea.hbm %s1190_s5, 64 }
 0x222   : > { %p791_p9 = scmp.ne.s32.totalorder %s1141_s17, %s790_s3  ;;  %p795_p10 = scmp.lt.u32.totalorder %s1141_s17, %s1190_s5 }
 0x223   : > { %p796_p12 = scmp.lt.u32.totalorder %s794_s26, %s790_s3  ;;  %p798_p4 = scmp.lt.u32.totalorder %s790_s3, %s1141_s17 }
 0x224   : > { %p792_p7 = pnand %p791_p9, %p1215_p13 }
 0x225   : > { %p797_p1 = por %p796_p12, %p795_p10 }
 0x226   : > { %p793_p11 = pneg %p792_p7 }
 0x227   : > { %p799_p2 = por %p798_p4, %p797_p1 }
 0x229   : > { %p800_p6 = pnand %p799_p2, %p793_p11 }
 0x22b   : > { %803 = shalt.err (!%p800_p6)
}
 0x22c   : > { %573 = dma.vmem_to_hbm [thread:$0]  (%p1215_p13), %s1143_s16, 32, %s1141_s17, %s398_s27  }
 0x22d PF: > { %s423_s24 = sand.u32 1, %s846_s18   ;;  %p1216_p0 = scmp.ne.s32.totalorder %s1198_s25, 0 }
 0x22e   : > { %p1217_p3 = scmp.ge.s32.totalorder %s858_s21, 2  ;;  %s424_s6 = scalar_lea.sflag [#allocation5], %s423_s24 }
 0x230   : > { %p593_p8 = pnand %p1217_p3, %p1216_p0 }
 0x232   : > { %841 = dma.done.wait (!%p593_p8), %s424_s6, 32  }
 0x233   : > { %843 = vsyncadd (!%p593_p8), %s424_s6, 4294967264  ;;  %p23_p5 = scmp.ge.s32.totalorder %s952_s7, 4   ;;  %s1218_s18 = smov %s850_s19 }
 0x234   : > { %s1219_s19 = smov %s854_s20  ;;  %s1220_s20 = smov %s1025_s29 }
 0x235   : > { %s1221_s21 = smov %s952_s7  ;;  %25 = sbr.rel (!%p23_p5) target bundleno = 12 (0xc), region = 111 }
 0x23c   :  { %429 = vsyncpa [#allocation4], 1 }
 0x23d   :  { %431 = vsyncpa [#allocation4 + $0x1], 1 }
 0x23e   :  { %432 = vsyncpa [#allocation9], 1 }
 0x23f   :  { %434 = vsyncpa [#allocation9 + $0x1], 1 }
 0x240   :  { %435 = vsyncpa [#allocation12], 1 }
 0x241   :  { %436 = vsyncpa [#allocation5], 1 }
 0x242   :  { %438 = vsyncpa [#allocation5 + $0x1], 1 }
 0x243   :  { %439 = vsyncpa [#allocation6], 1 }
 0x244   :  { %441 = vsyncpa [#allocation6 + $0x1], 1 }

</bundles_post_ra>
